<compile_context>
chip_gen: v5e
topology: v5e:2x2
jax: 0.10.0
libtpu: 0.0.40
codegen_flags: <defaults>
</compile_context>

<pallas_src>
import jax
import jax.numpy as jnp
from jax import lax
from jax.experimental import pallas as pl
from jax.experimental.pallas import tpu as pltpu


def dgi_kernel(seq1_ref, seq2_ref, adj_ref, wt_ref, bias_ref, wbt_ref, scal_ref,
               out_ref, fts1_ref, fts2_ref, h1_ref, h2_ref):
    """Grid = (batch, row_tiles).  One batch element per outer step.

    seq1_ref/seq2_ref : (1, N, Fin) bf16   resident across row tiles
    adj_ref           : (1, TM, N)  bf16   row tile of the adjacency
    wt_ref            : (Fin, n_h)  bf16   GCN Linear weight, pre-transposed
    bias_ref          : (1, n_h)    f32    GCN bias
    wbt_ref           : (n_h, n_h)  bf16   Bilinear weight W[0]^T
    scal_ref          : (2,)        f32    SMEM: [prelu_slope, bilinear_bias]
    out_ref           : (1, 1, 2N)  f32    logits row for this batch element
    fts1_ref/fts2_ref : (N, n_h)    bf16   scratch: first-layer features
    h1_ref/h2_ref     : (N, n_h)    f32    scratch: GCN outputs (PReLU'd)
    """
    r = pl.program_id(1)
    n_row_tiles = pl.num_programs(1)
    n = h1_ref.shape[0]
    tm = adj_ref.shape[1]

    a = scal_ref[0]        # PReLU slope
    bb = scal_ref[1]       # Bilinear bias

    # --- row tile 0: first-layer linear for both branches (stays resident) --
    @pl.when(r == 0)
    def _():
        fts1_ref[...] = jnp.dot(seq1_ref[0], wt_ref[...],
                                preferred_element_type=jnp.float32
                                ).astype(jnp.bfloat16)
        fts2_ref[...] = jnp.dot(seq2_ref[0], wt_ref[...],
                                preferred_element_type=jnp.float32
                                ).astype(jnp.bfloat16)

    # --- every row tile: adj_tile @ fts + bias, PReLU, into resident h ------
    adj_t = adj_ref[0]                          # (TM, N) bf16
    bias = bias_ref[...]                        # (1, n_h) f32
    pre1 = jnp.dot(adj_t, fts1_ref[...], preferred_element_type=jnp.float32) + bias
    pre2 = jnp.dot(adj_t, fts2_ref[...], preferred_element_type=jnp.float32) + bias

    row0 = pl.multiple_of(r * tm, tm)
    h1_ref[pl.ds(row0, tm), :] = jnp.where(pre1 > 0, pre1, a * pre1)
    h2_ref[pl.ds(row0, tm), :] = jnp.where(pre2 > 0, pre2, a * pre2)

    # --- last row tile: AvgReadout -> sigmoid -> bilinear discriminator -----
    @pl.when(r == n_row_tiles - 1)
    def _():
        h1 = h1_ref[...]                                         # (N, n_h) f32
        h2 = h2_ref[...]
        c = jax.nn.sigmoid(jnp.mean(h1, axis=0, keepdims=True))  # (1, n_h) f32
        # u = c @ W0^T  so that  sc[k] = h[k,:] . u  (== h @ W0 @ c)
        u = jnp.dot(c.astype(jnp.bfloat16), wbt_ref[...],
                    preferred_element_type=jnp.float32).astype(jnp.bfloat16)
        # Two NT dots -> lane-dense (1, N) rows; no (2N, n_h) concat.
        sc1 = lax.dot_general(u, h1.astype(jnp.bfloat16),
                              (((1,), (1,)), ((), ())),
                              preferred_element_type=jnp.float32) + bb
        sc2 = lax.dot_general(u, h2.astype(jnp.bfloat16),
                              (((1,), (1,)), ((), ())),
                              preferred_element_type=jnp.float32) + bb
        out_ref[0, :, :n] = sc1
        out_ref[0, :, n:] = sc2


def _as_bf16(x):
    return x if x.dtype == jnp.bfloat16 else x.astype(jnp.bfloat16)


def _pick_row_tile(n):
    for cand in (1024, 512, 256, 128):
        if n % cand == 0:
            return cand
    return n  # small graphs: single row tile


def _vmem_limit_bytes(n, fin, n_h, tm):
    bf, f4 = 2, 4
    b = 0
    b += 2 * 2 * (n * fin * bf)                       # seq1 + seq2, double buffered
    b += 2 * (tm * n * bf)                            # adj row tile, double buffered
    b += 2 * (fin * n_h * bf + n_h * f4 + n_h * n_h * bf)   # weights + bias
    b += 2 * (2 * n * f4)                             # output block
    b += 2 * (n * n_h * bf) + 2 * (n * n_h * f4)      # fts + h scratch
    return min(48 * 1024 * 1024, max(2 * b, 16 * 1024 * 1024))


def dgi_forward(seq1, seq2, adj, w, gcn_bias, prelu_a, wb, bil_bias, *, row_tile=None):
    """seq1/seq2/adj should ideally already be bf16 (cast hoisted by caller)."""
    B, N, Fin = seq1.shape
    n_h = w.shape[0]
    if row_tile is None:
        row_tile = _pick_row_tile(N)
    n_row_tiles = N // row_tile

    seq1_b = _as_bf16(seq1)
    seq2_b = _as_bf16(seq2)
    adj_b = _as_bf16(adj)
    wt = _as_bf16(jnp.asarray(w, jnp.float32).T)                          # (Fin, n_h)
    bias = jnp.asarray(gcn_bias, jnp.float32).reshape(1, n_h)             # (1, n_h)
    wbt = _as_bf16(jnp.asarray(wb, jnp.float32).T)                        # (n_h, n_h)
    scalars = jnp.stack([jnp.asarray(prelu_a, jnp.float32),
                         jnp.asarray(bil_bias, jnp.float32)])             # (2,) SMEM

    out = pl.pallas_call(
        dgi_kernel,
        out_shape=jax.ShapeDtypeStruct((B, 1, 2 * N), jnp.float32),
        grid_spec=pltpu.PrefetchScalarGridSpec(
            num_scalar_prefetch=0,
            grid=(B, n_row_tiles),
            in_specs=[
                pl.BlockSpec((1, N, Fin), lambda b, r: (b, 0, 0)),        # seq1
                pl.BlockSpec((1, N, Fin), lambda b, r: (b, 0, 0)),        # seq2
                pl.BlockSpec((1, row_tile, N), lambda b, r: (b, r, 0)),   # adj row tile
                pl.BlockSpec((Fin, n_h), lambda b, r: (0, 0)),            # GCN W^T
                pl.BlockSpec((1, n_h), lambda b, r: (0, 0)),              # GCN bias
                pl.BlockSpec((n_h, n_h), lambda b, r: (0, 0)),            # Bilinear W^T
                pl.BlockSpec(memory_space=pltpu.MemorySpace.SMEM),        # scalars
            ],
            out_specs=pl.BlockSpec((1, 1, 2 * N), lambda b, r: (b, 0, 0)),
            scratch_shapes=[
                pltpu.VMEM((N, n_h), jnp.bfloat16),   # fts1
                pltpu.VMEM((N, n_h), jnp.bfloat16),   # fts2
                pltpu.VMEM((N, n_h), jnp.float32),    # h1
                pltpu.VMEM((N, n_h), jnp.float32),    # h2
            ],
        ),
        compiler_params=pltpu.CompilerParams(
            dimension_semantics=("parallel", "arbitrary"),
            vmem_limit_bytes=_vmem_limit_bytes(N, Fin, n_h, row_tile)),
    )(seq1_b, seq2_b, adj_b, wt, bias, wbt, scalars)
    return out.reshape(B, 2 * N)


def dgi_ref(seq1, seq2, adj, w, gcn_bias, prelu_a, wb, bil_bias):
    """Pure-JAX reference mirroring the PyTorch forward and the kernel's bf16 casts."""
    f32 = jnp.float32
    bf = lambda x: x.astype(jnp.bfloat16).astype(f32)
    seq1 = bf(seq1)
    seq2 = bf(seq2)
    adj = bf(adj)
    w_ = bf(w)
    wb_ = bf(wb)

    def gcn(seq):
        fts = bf(jnp.einsum('bnf,hf->bnh', seq, w_))     # mirror in-kernel bf16 cast
        out = jnp.einsum('bnm,bmh->bnh', adj, fts) + gcn_bias
        return jnp.where(out > 0, out, prelu_a * out)

    h1 = gcn(seq1)
    h2 = gcn(seq2)
    c = jax.nn.sigmoid(jnp.mean(h1, axis=1))                             # (B, n_h)
    u = bf(jnp.einsum('bk,hk->bh', bf(c), wb_))                          # c @ W0^T
    sc1 = jnp.einsum('bnh,bh->bn', bf(h1), u) + bil_bias
    sc2 = jnp.einsum('bnh,bh->bn', bf(h2), u) + bil_bias
    return jnp.concatenate([sc1, sc2], axis=1)


def xavier_uniform(key, shape, fan_in, fan_out, dtype=jnp.float32):
    bound = jnp.sqrt(6.0 / (fan_in + fan_out))
    return jax.random.uniform(key, shape, dtype, minval=-bound, maxval=bound)


if __name__ == "__main__":
    B, N, n_in, n_h = 2, 8, 16, 32

    key = jax.random.PRNGKey(0)
    k_seq1, k_seq2, k_adj, k_w, k_wb = jax.random.split(key, 5)

    seq1 = jax.random.normal(k_seq1, (B, N, n_in), jnp.float32)
    seq2 = jax.random.normal(k_seq2, (B, N, n_in), jnp.float32)
    # Dense row-normalized adjacency (deterministic).
    adj_raw = jax.nn.relu(jax.random.normal(k_adj, (B, N, N), jnp.float32)) + \
        jnp.eye(N, dtype=jnp.float32)[None]
    adj = adj_raw / jnp.sum(adj_raw, axis=-1, keepdims=True)

    # Parameters (shapes match the PyTorch module's __init__).
    w = xavier_uniform(k_w, (n_h, n_in), fan_in=n_in, fan_out=n_h)        # GCN Linear
    gcn_bias = jnp.zeros((n_h,), jnp.float32)                             # GCN bias
    prelu_a = jnp.float32(0.25)                                           # PReLU default
    wb = xavier_uniform(k_wb, (n_h, n_h), fan_in=n_h * n_h, fan_out=n_h)  # Bilinear W[0]
    bil_bias = jnp.float32(0.0)                                           # Bilinear bias

    # Hoist the activation / adjacency bf16 casts out of the per-call path.
    seq1_bf = seq1.astype(jnp.bfloat16)
    seq2_bf = seq2.astype(jnp.bfloat16)
    adj_bf = adj.astype(jnp.bfloat16)

    logits = dgi_forward(seq1_bf, seq2_bf, adj_bf, w, gcn_bias, prelu_a, wb, bil_bias)
    logits = jax.block_until_ready(logits)

    ref = dgi_ref(seq1, seq2, adj, w, gcn_bias, prelu_a, wb, bil_bias)
    assert logits.shape == (B, 2 * N), logits.shape
    assert jnp.allclose(logits, ref, rtol=1e-2, atol=1e-2), \
        float(jnp.max(jnp.abs(logits - ref)))

    print("KERNEL_OK")
</pallas_src>

<mosaic_0001>
module attributes {stable_mosaic.version = 11 : i64} {
  func.func @dgi_kernel(%arg0: i32, %arg1: i32, %arg2: memref<1x8x16xbf16, #tpu.memory_space<vmem>>, %arg3: memref<1x8x16xbf16, #tpu.memory_space<vmem>>, %arg4: memref<1x8x8xbf16, #tpu.memory_space<vmem>>, %arg5: memref<16x32xbf16, #tpu.memory_space<vmem>>, %arg6: memref<1x32xf32, #tpu.memory_space<vmem>>, %arg7: memref<32x32xbf16, #tpu.memory_space<vmem>>, %arg8: memref<2xf32, #tpu.memory_space<smem>>, %arg9: memref<1x1x16xf32, #tpu.memory_space<vmem>>, %arg10: memref<8x32xbf16, #tpu.memory_space<vmem>>, %arg11: memref<8x32xbf16, #tpu.memory_space<vmem>>, %arg12: memref<8x32xf32, #tpu.memory_space<vmem>>, %arg13: memref<8x32xf32, #tpu.memory_space<vmem>>) attributes {dimension_semantics = [#tpu.dimension_semantics<parallel>, #tpu.dimension_semantics<arbitrary>], iteration_bounds = array<i64: 2, 1>, scalar_prefetch = 0 : i64, scratch_operands = 4 : i64, tpu.core_type = #tpu.core_type<tc>, window_params = [{transform_indices = @transform_0, window_bounds = array<i64: 1, 8, 16>}, {transform_indices = @transform_1, window_bounds = array<i64: 1, 8, 16>}, {transform_indices = @transform_2, window_bounds = array<i64: 1, 8, 8>}, {pipeline_mode = #tpu.pipeline_mode<synchronous>, transform_indices = @transform_3, window_bounds = array<i64: 16, 32>}, {pipeline_mode = #tpu.pipeline_mode<synchronous>, transform_indices = @transform_4, window_bounds = array<i64: 1, 32>}, {pipeline_mode = #tpu.pipeline_mode<synchronous>, transform_indices = @transform_5, window_bounds = array<i64: 32, 32>}, {transform_indices = @transform_6, window_bounds = array<i64: 2>}, {transform_indices = @transform_7, window_bounds = array<i64: 1, 1, 16>}]} {
    %c0 = arith.constant 0 : index
    %0 = memref.load %arg8[%c0] : memref<2xf32, #tpu.memory_space<smem>>
    %c1 = arith.constant 1 : index
    %1 = memref.load %arg8[%c1] : memref<2xf32, #tpu.memory_space<smem>>
    %c0_i32 = arith.constant 0 : i32
    %2 = arith.cmpi eq, %arg1, %c0_i32 : i32
    %3 = arith.extui %2 : i1 to i32
    %c0_i32_0 = arith.constant 0 : i32
    %4 = arith.cmpi ne, %3, %c0_i32_0 : i32
    scf.if %4 {
      %c0_17 = arith.constant 0 : index
      %c0_18 = arith.constant 0 : index
      %c0_19 = arith.constant 0 : index
      %35 = vector.load %arg2[%c0_17, %c0_18, %c0_19] : memref<1x8x16xbf16, #tpu.memory_space<vmem>>, vector<1x8x16xbf16>
      %36 = vector.shape_cast %35 : vector<1x8x16xbf16> to vector<8x16xbf16>
      %c0_20 = arith.constant 0 : index
      %c0_21 = arith.constant 0 : index
      %37 = vector.load %arg5[%c0_20, %c0_21] : memref<16x32xbf16, #tpu.memory_space<vmem>>, vector<16x32xbf16>
      %cst_22 = arith.constant dense<0.000000e+00> : vector<8x32xf32>
      %38 = tpu.matmul %36, %37, %cst_22 {dimension_numbers = #tpu.dot_dimension_numbers<[1], [0], [0], [1], [0, 0, 1, 1], [], []>} : vector<8x16xbf16>, vector<16x32xbf16>, vector<8x32xf32> -> vector<8x32xf32>
      %39 = arith.truncf %38 : vector<8x32xf32> to vector<8x32xbf16>
      %c0_23 = arith.constant 0 : index
      %c0_24 = arith.constant 0 : index
      %40 = vector.load %arg10[%c0_23, %c0_24] : memref<8x32xbf16, #tpu.memory_space<vmem>>, vector<8x32xbf16>
      tpu.vector_store %arg10[%c0_23, %c0_24], %39 {strides = array<i32>} : memref<8x32xbf16, #tpu.memory_space<vmem>>, vector<8x32xbf16>,
      %c0_25 = arith.constant 0 : index
      %c0_26 = arith.constant 0 : index
      %c0_27 = arith.constant 0 : index
      %41 = vector.load %arg3[%c0_25, %c0_26, %c0_27] : memref<1x8x16xbf16, #tpu.memory_space<vmem>>, vector<1x8x16xbf16>
      %42 = vector.shape_cast %41 : vector<1x8x16xbf16> to vector<8x16xbf16>
      %c0_28 = arith.constant 0 : index
      %c0_29 = arith.constant 0 : index
      %43 = vector.load %arg5[%c0_28, %c0_29] : memref<16x32xbf16, #tpu.memory_space<vmem>>, vector<16x32xbf16>
      %cst_30 = arith.constant dense<0.000000e+00> : vector<8x32xf32>
      %44 = tpu.matmul %42, %43, %cst_30 {dimension_numbers = #tpu.dot_dimension_numbers<[1], [0], [0], [1], [0, 0, 1, 1], [], []>} : vector<8x16xbf16>, vector<16x32xbf16>, vector<8x32xf32> -> vector<8x32xf32>
      %45 = arith.truncf %44 : vector<8x32xf32> to vector<8x32xbf16>
      %c0_31 = arith.constant 0 : index
      %c0_32 = arith.constant 0 : index
      %46 = vector.load %arg11[%c0_31, %c0_32] : memref<8x32xbf16, #tpu.memory_space<vmem>>, vector<8x32xbf16>
      tpu.vector_store %arg11[%c0_31, %c0_32], %45 {strides = array<i32>} : memref<8x32xbf16, #tpu.memory_space<vmem>>, vector<8x32xbf16>,
    } else {
    }
    %c0_1 = arith.constant 0 : index
    %c0_2 = arith.constant 0 : index
    %c0_3 = arith.constant 0 : index
    %5 = vector.load %arg4[%c0_1, %c0_2, %c0_3] : memref<1x8x8xbf16, #tpu.memory_space<vmem>>, vector<1x8x8xbf16>
    %6 = vector.shape_cast %5 : vector<1x8x8xbf16> to vector<8x8xbf16>
    %c0_4 = arith.constant 0 : index
    %c0_5 = arith.constant 0 : index
    %7 = vector.load %arg6[%c0_4, %c0_5] : memref<1x32xf32, #tpu.memory_space<vmem>>, vector<1x32xf32>
    %c0_6 = arith.constant 0 : index
    %c0_7 = arith.constant 0 : index
    %8 = vector.load %arg10[%c0_6, %c0_7] : memref<8x32xbf16, #tpu.memory_space<vmem>>, vector<8x32xbf16>
    %cst = arith.constant dense<0.000000e+00> : vector<8x32xf32>
    %9 = tpu.matmul %6, %8, %cst {dimension_numbers = #tpu.dot_dimension_numbers<[1], [0], [0], [1], [0, 0, 1, 1], [], []>} : vector<8x8xbf16>, vector<8x32xbf16>, vector<8x32xf32> -> vector<8x32xf32>
    %10 = vector.broadcast %7 : vector<1x32xf32> to vector<8x32xf32>
    %11 = arith.addf %9, %10 : vector<8x32xf32>
    %c0_8 = arith.constant 0 : index
    %c0_9 = arith.constant 0 : index
    %12 = vector.load %arg11[%c0_8, %c0_9] : memref<8x32xbf16, #tpu.memory_space<vmem>>, vector<8x32xbf16>
    %cst_10 = arith.constant dense<0.000000e+00> : vector<8x32xf32>
    %13 = tpu.matmul %6, %12, %cst_10 {dimension_numbers = #tpu.dot_dimension_numbers<[1], [0], [0], [1], [0, 0, 1, 1], [], []>} : vector<8x8xbf16>, vector<8x32xbf16>, vector<8x32xf32> -> vector<8x32xf32>
    %14 = vector.broadcast %7 : vector<1x32xf32> to vector<8x32xf32>
    %15 = arith.addf %13, %14 : vector<8x32xf32>
    %c8_i32 = arith.constant 8 : i32
    %16 = arith.muli %arg1, %c8_i32 : i32
    %17 = tpu.assume_multiple %16, 8 : i32
    %cst_11 = arith.constant 0.000000e+00 : f32
    %18 = vector.broadcast %cst_11 : f32 to vector<8x32xf32>
    %19 = arith.cmpf ogt, %11, %18 : vector<8x32xf32>
    %20 = vector.broadcast %0 : f32 to vector<8x32xf32>
    %21 = arith.mulf %20, %11 : vector<8x32xf32>
    %22 = arith.select %19, %11, %21 : vector<8x32xi1>, vector<8x32xf32>
    %23 = arith.index_cast %17 : i32 to index
    %c0_12 = arith.constant 0 : index
    %24 = vector.load %arg12[%23, %c0_12] : memref<8x32xf32, #tpu.memory_space<vmem>>, vector<8x32xf32>
    tpu.vector_store %arg12[%23, %c0_12], %22 {strides = array<i32>} : memref<8x32xf32, #tpu.memory_space<vmem>>, vector<8x32xf32>,
    %cst_13 = arith.constant 0.000000e+00 : f32
    %25 = vector.broadcast %cst_13 : f32 to vector<8x32xf32>
    %26 = arith.cmpf ogt, %15, %25 : vector<8x32xf32>
    %27 = vector.broadcast %0 : f32 to vector<8x32xf32>
    %28 = arith.mulf %27, %15 : vector<8x32xf32>
    %29 = arith.select %26, %15, %28 : vector<8x32xi1>, vector<8x32xf32>
    %30 = arith.index_cast %17 : i32 to index
    %c0_14 = arith.constant 0 : index
    %31 = vector.load %arg13[%30, %c0_14] : memref<8x32xf32, #tpu.memory_space<vmem>>, vector<8x32xf32>
    tpu.vector_store %arg13[%30, %c0_14], %29 {strides = array<i32>} : memref<8x32xf32, #tpu.memory_space<vmem>>, vector<8x32xf32>,
    %c0_i32_15 = arith.constant 0 : i32
    %32 = arith.cmpi eq, %arg1, %c0_i32_15 : i32
    %33 = arith.extui %32 : i1 to i32
    %c0_i32_16 = arith.constant 0 : i32
    %34 = arith.cmpi ne, %33, %c0_i32_16 : i32
    scf.if %34 {
      %c0_17 = arith.constant 0 : index
      %c0_18 = arith.constant 0 : index
      %35 = vector.load %arg12[%c0_17, %c0_18] : memref<8x32xf32, #tpu.memory_space<vmem>>, vector<8x32xf32>
      %c0_19 = arith.constant 0 : index
      %c0_20 = arith.constant 0 : index
      %36 = vector.load %arg13[%c0_19, %c0_20] : memref<8x32xf32, #tpu.memory_space<vmem>>, vector<8x32xf32>
      %cst_21 = arith.constant dense<0.000000e+00> : vector<32xf32>
      %37 = vector.multi_reduction <add>, %35, %cst_21 [0] : vector<8x32xf32> to vector<32xf32>
      %38 = vector.shape_cast %37 : vector<32xf32> to vector<1x32xf32>
      %cst_22 = arith.constant 8.000000e+00 : f32
      %39 = vector.broadcast %cst_22 : f32 to vector<1x32xf32>
      %40 = arith.divf %38, %39 : vector<1x32xf32>
      %41 = arith.negf %40 : vector<1x32xf32>
      %42 = math.exp %41 : vector<1x32xf32>
      %cst_23 = arith.constant 1.000000e+00 : f32
      %43 = vector.broadcast %cst_23 : f32 to vector<1x32xf32>
      %44 = arith.addf %43, %42 : vector<1x32xf32>
      %45 = arith.divf %43, %44 : vector<1x32xf32>
      %46 = arith.truncf %45 : vector<1x32xf32> to vector<1x32xbf16>
      %c0_24 = arith.constant 0 : index
      %c0_25 = arith.constant 0 : index
      %47 = vector.load %arg7[%c0_24, %c0_25] : memref<32x32xbf16, #tpu.memory_space<vmem>>, vector<32x32xbf16>
      %cst_26 = arith.constant dense<0.000000e+00> : vector<1x32xf32>
      %48 = tpu.matmul %46, %47, %cst_26 {dimension_numbers = #tpu.dot_dimension_numbers<[1], [0], [0], [1], [0, 0, 1, 1], [], []>} : vector<1x32xbf16>, vector<32x32xbf16>, vector<1x32xf32> -> vector<1x32xf32>
      %49 = arith.truncf %48 : vector<1x32xf32> to vector<1x32xbf16>
      %50 = arith.truncf %35 : vector<8x32xf32> to vector<8x32xbf16>
      %cst_27 = arith.constant dense<0.000000e+00> : vector<1x8xf32>
      %51 = tpu.matmul %49, %50, %cst_27 {dimension_numbers = #tpu.dot_dimension_numbers<[1], [1], [0], [0], [0, 0, 1, 0], [], []>} : vector<1x32xbf16>, vector<8x32xbf16>, vector<1x8xf32> -> vector<1x8xf32>
      %52 = vector.broadcast %1 : f32 to vector<1x8xf32>
      %53 = arith.addf %51, %52 : vector<1x8xf32>
      %54 = arith.truncf %36 : vector<8x32xf32> to vector<8x32xbf16>
      %cst_28 = arith.constant dense<0.000000e+00> : vector<1x8xf32>
      %55 = tpu.matmul %49, %54, %cst_28 {dimension_numbers = #tpu.dot_dimension_numbers<[1], [1], [0], [0], [0, 0, 1, 0], [], []>} : vector<1x32xbf16>, vector<8x32xbf16>, vector<1x8xf32> -> vector<1x8xf32>
      %56 = vector.broadcast %1 : f32 to vector<1x8xf32>
      %57 = arith.addf %55, %56 : vector<1x8xf32>
      %c0_29 = arith.constant 0 : index
      %c0_30 = arith.constant 0 : index
      %c0_31 = arith.constant 0 : index
      %58 = vector.load %arg9[%c0_29, %c0_30, %c0_31] : memref<1x1x16xf32, #tpu.memory_space<vmem>>, vector<1x1x8xf32>
      %59 = vector.shape_cast %58 : vector<1x1x8xf32> to vector<1x8xf32>
      %60 = vector.shape_cast %53 : vector<1x8xf32> to vector<1x1x8xf32>
      tpu.vector_store %arg9[%c0_29, %c0_30, %c0_31], %60 {strides = array<i32>} : memref<1x1x16xf32, #tpu.memory_space<vmem>>, vector<1x1x8xf32>,
      %c0_32 = arith.constant 0 : index
      %c0_33 = arith.constant 0 : index
      %c8 = arith.constant 8 : index
      %61 = vector.load %arg9[%c0_32, %c0_33, %c8] : memref<1x1x16xf32, #tpu.memory_space<vmem>>, vector<1x1x8xf32>
      %62 = vector.shape_cast %61 : vector<1x1x8xf32> to vector<1x8xf32>
      %63 = vector.shape_cast %57 : vector<1x8xf32> to vector<1x1x8xf32>
      tpu.vector_store %arg9[%c0_32, %c0_33, %c8], %63 {strides = array<i32>} : memref<1x1x16xf32, #tpu.memory_space<vmem>>, vector<1x1x8xf32>,
    } else {
    }
    return
  }
  func.func @transform_0(%arg0: i32, %arg1: i32) -> (i32, i32, i32) {
    %c0_i32 = arith.constant 0 : i32
    %c0_i32_0 = arith.constant 0 : i32
    %c0_i32_1 = arith.constant 0 : i32
    return %arg0, %c0_i32, %c0_i32_0 : i32, i32, i32
  }
  func.func @transform_1(%arg0: i32, %arg1: i32) -> (i32, i32, i32) {
    %c0_i32 = arith.constant 0 : i32
    %c0_i32_0 = arith.constant 0 : i32
    %c0_i32_1 = arith.constant 0 : i32
    return %arg0, %c0_i32, %c0_i32_0 : i32, i32, i32
  }
  func.func @transform_2(%arg0: i32, %arg1: i32) -> (i32, i32, i32) {
    %c0_i32 = arith.constant 0 : i32
    %c0_i32_0 = arith.constant 0 : i32
    return %arg0, %arg1, %c0_i32 : i32, i32, i32
  }
  func.func @transform_3(%arg0: i32, %arg1: i32) -> (i32, i32) {
    %c0_i32 = arith.constant 0 : i32
    %c0_i32_0 = arith.constant 0 : i32
    %c0_i32_1 = arith.constant 0 : i32
    return %c0_i32, %c0_i32_0 : i32, i32
  }
  func.func @transform_4(%arg0: i32, %arg1: i32) -> (i32, i32) {
    %c0_i32 = arith.constant 0 : i32
    %c0_i32_0 = arith.constant 0 : i32
    %c0_i32_1 = arith.constant 0 : i32
    return %c0_i32, %c0_i32_0 : i32, i32
  }
  func.func @transform_5(%arg0: i32, %arg1: i32) -> (i32, i32) {
    %c0_i32 = arith.constant 0 : i32
    %c0_i32_0 = arith.constant 0 : i32
    %c0_i32_1 = arith.constant 0 : i32
    return %c0_i32, %c0_i32_0 : i32, i32
  }
  func.func @transform_6(%arg0: i32, %arg1: i32) -> i32 {
    %c0_i32 = arith.constant 0 : i32
    %c0_i32_0 = arith.constant 0 : i32
    return %c0_i32 : i32
  }
  func.func @transform_7(%arg0: i32, %arg1: i32) -> (i32, i32, i32) {
    %c0_i32 = arith.constant 0 : i32
    %c0_i32_0 = arith.constant 0 : i32
    %c0_i32_1 = arith.constant 0 : i32
    return %arg0, %c0_i32, %c0_i32_0 : i32, i32, i32
  }
}

</mosaic_0001>

<bundles_post_ra>
// kernel: tpu_custom_call.1
= control target key start
LH: loop header
LB: loop body
LE: loop exit
PB: predicated region body
PF: predicated region fallthrough
CT: control target
= control target key end

     0   :  { %s1531_s0 = inlined_call_operand.hbm [shape: bf16[2,8,16], index: 0, kind: input, shape index: {}]   ;;  %s1532_s1 = inlined_call_operand.hbm [shape: bf16[2,8,16], index: 1, kind: input, shape index: {}]   ;;  %s1533_s2 = inlined_call_operand.hbm [shape: bf16[2,8,8], index: 2, kind: input, shape index: {}]   ;;  %s1534_s3 = inlined_call_operand.hbm [shape: bf16[16,32], index: 3, kind: input, shape index: {}]   ;;  %s1535_s4 = inlined_call_operand.vmem [shape: f32[1,32], index: 4, kind: input, shape index: {}]   ;;  %s1536_s5 = inlined_call_operand.hbm [shape: bf16[32,32], index: 5, kind: input, shape index: {}]   ;;  %s1537_s6 = inlined_call_operand.vmem [shape: f32[2], index: 6, kind: input, shape index: {}]   ;;  %s1538_s7 = inlined_call_operand.hbm [shape: f32[2,1,16], index: 7, kind: output, shape index: {}]  }
   0x1   :  { %1548 = sst [smem:[#allocation30_spill]] %s1532_s1 }
   0x2   :  { %1549 = sst [smem:[#allocation31_spill]] %s1534_s3 }
   0x3   :  { %1550 = sst [smem:[#allocation32_spill]] %s1536_s5 }
   0x4   :  { %1551 = sst [smem:[#allocation33_spill]] %s1537_s6 }
   0x5   :  { %12 = vsyncpa [#allocation7], 0 }
   0x6   :  { %14 = vsyncpa [#allocation7 + $0x1], 0 }
   0x7   :  { %15 = vsyncpa [#allocation11], 0 }
   0x8   :  { %17 = vsyncpa [#allocation11 + $0x1], 0 }
   0x9   :  { %18 = vsyncpa [#allocation14], 0 }
   0xa   :  { %19 = vsyncpa [#allocation9], 0 }
   0xb   :  { %20 = vsyncpa [#allocation8], 0 }
   0xc   :  { %22 = vsyncpa [#allocation8 + $0x1], 0  ;;  %s1310_s24 = smov 0   ;;  %s1312_s25 = smov 0  }
   0xd   :  { %s1314_s26 = smov 0   ;;  %s1316_s27 = smov 0  }
   0xe   :  { %s1318_s28 = smov 0   ;;  %s1320_s29 = smov 0  }
   0xf LB: > { %1552 = sst [smem:[#allocation23_spill]] %s1241_s24  ;;  %s1341_s30 = sadd.s32 4294967295, %s1261_s29   ;;  %s1261_s29 = sphi %s1320_s29, %s28_s29   ;;  %s1257_s28 = sphi %s1318_s28, %s1579_s28   ;;  %s1253_s27 = sphi %s1316_s27, %s1578_s27   ;;  %s1249_s26 = sphi %s1314_s26, %s1577_s26   ;;  %s1245_s25 = sphi %s1312_s25, %s1581_s25   ;;  %s1241_s24 = sphi %s1310_s24, %s1580_s24  }
  0x10   : > { %1553 = sst [smem:[#allocation24_spill]] %s1249_s26  ;;  %p839_p0 = scmp.ge.s32.totalorder %s1261_s29, 1 }
  0x11   : > { %1554 = sst [smem:[#allocation25_spill]] %s1257_s28  ;;  %p61_p1 = scmp.eq.s32.totalorder %s1341_s30, 0 }
  0x12   : > { %1555 = sst [smem:[#allocation26_spill]] %s1261_s29  ;;  %p235_p2 = scmp.lt.s32.totalorder %s1261_s29, 3 }
  0x13   : > { %s1556_s3 = sld [smem:[#allocation31_spill]]  ;;  %s1263_s12 = smov [#allocation13]  }
  0x14   : > { %p1349_p3 = pnand %p839_p0, %p235_p2  ;;  %s248_s13 = sshll.u32 %s1263_s12, 4  ;;  %s249_s13 = int_to_ptr.vmem [resolvable:$true] %s248_s13 }
  0x15   : > { %s1539_s15 = smov 64   ;;  %s1540_s16 = smov 4  }
  0x16   : > { %p908_p4 = pneg %p1349_p3  ;;  %s838_s17 = sadd.s32 4294967294, %s1261_s29  }
  0x17   : > { %s40_s18 = sadd.s32 1, %s1257_s28  ;;  %s47_s19 = sadd.s32 1, %s1249_s26 }
  0x18   : > { %p1357_p5 = pnand %p908_p4, %p61_p1  ;;  %p42_p7 = scmp.ge.s32.totalorder %s40_s18, 2 }
  0x19   : > { %s246_s10 = sshll.u32 %s1556_s3, 4  ;;  %p54_p8 = scmp.ne.s32.totalorder %s1249_s26, %s1245_s25  ;;  %s247_s10 = int_to_ptr.hbm [resolvable:$true] %s246_s10 }
  0x1a   : > { %911 = dma.hbm_to_vmem [thread:$0]  (!%p1357_p5), %s247_s10, 128, %s249_s13, [#allocation14], %s1539_s15, %s1539_s15, %s1540_s16  }
  0x1b   : > { %p55_p9 = scmp.eq.s32.totalorder %s1261_s29, 0  ;;  %p60_p10 = scmp.ne.s32.totalorder %s1245_s25, %s1241_s24 }
  0x1c   : > { %s1583_s18 = smov (%p42_p7, %s40_s18), 0  ;;  %p222_p13 = scmp.eq.s32.totalorder %s1341_s30, 1 }
  0x1d   : > { %1559 = sst [smem:[#allocation27_spill]] %s1583_s18  ;;  %p1377_p11 = por %p55_p9, %p54_p8 }
  0x1e   : > { %p1383_p12 = por %p61_p1, %p60_p10  ;;  %s44_s22 = ssub.s32 %s1257_s28, %s1583_s18 }
  0x1f   : > { %p45_p0 = scmp.eq.s32.totalorder %s44_s22, 0  ;;  %p228_p2 = scmp.eq.s32.totalorder %s838_s17, 1 }
  0x20   : > { %p1390_p4 = por %p222_p13, %p54_p8  ;;  %p935_p7 = scmp.lt.s32.totalorder %s1261_s29, 2 }
  0x21   : > { %s1396_s8 = scalar_select %p45_p0, %s1249_s26, %s47_s19  }
  0x22   : > { %p1398_p9 = por %p228_p2, %p60_p10  ;;  %s289_s10 = sand.u32 1, %s1249_s26  }
  0x23   : > { %1563 = sst [smem:[#allocation28_spill]] %s1396_s8  ;;  %s1403_s12 = sshll.u32 %s289_s10, 2 }
  0x24   : > { %s1564_s9 = scalar_select %p1398_p9, 1, 0 }
  0x25   : > { %s1406_s13 = sshll.u32 %s1257_s28, 2  ;;  %p1410_p6 = pnand %p935_p7, %p1377_p11 }
  0x26   : > { %1565 = sst [smem:[#allocation29_spill]] %s1564_s9  ;;  %s308_s19 = sand.u32 1, %s1261_s29  }
  0x27   : > { %s1567_s1 = sld [smem:[#allocation30_spill]]  ;;  %s312_s18 = scalar_lea.vmem [#allocation10], %s1403_s12 }
  0x28   : > { %s320_s8 = sshll.u32 %s312_s18, 4  ;;  %s309_s20 = scalar_lea.sflag [#allocation11], %s308_s19  ;;  %s321_s8 = int_to_ptr.vmem [resolvable:$true] %s320_s8 }
  0x29   : > { %s1568_s5 = sld [smem:[#allocation32_spill]]  ;;  %s1266_s29 = smov [#allocation15]  }
  0x2a   : > { %s265_s15 = sshll.u32 %s1266_s29, 4  ;;  %s1569_s6 = sld [smem:[#allocation33_spill]]  ;;  %s266_s15 = int_to_ptr.vmem [resolvable:$true] %s265_s15 }
  0x2b   : > { %s1571_s19 = smov 64   ;;  %s297_s29 = scalar_lea.hbm %s1531_s0, %s1406_s13 }
  0x2c   : > { %s299_s24 = sshll.u32 %s297_s29, 4  ;;  %s300_s24 = int_to_ptr.hbm [resolvable:$true] %s299_s24 }
  0x2d   : > { %s316_s16 = scalar_lea.hbm %s1567_s1, %s1406_s13  ;;  %s1570_s1 = smov 4  }
  0x2e   : > { %s318_s3 = sshll.u32 %s316_s16, 4  ;;  %s290_s16 = scalar_lea.sflag [#allocation7], %s289_s10  ;;  %s319_s3 = int_to_ptr.hbm [resolvable:$true] %s318_s3 }
  0x2f   : > { %924 = dma.hbm_to_vmem [thread:$0]  (!%p1410_p6), %s319_s3, 64, %s321_s8, %s309_s20  }
  0x30   : > { %s263_s9 = sshll.u32 %s1568_s5, 4  ;;  %s278_s18 = sshll.u32 %s1569_s6, 4  ;;  %s264_s9 = int_to_ptr.hbm [resolvable:$true] %s263_s9  ;;  %s279_s18 = int_to_ptr.vmem [resolvable:$true] %s278_s18 }
  0x31   : > { %914 = dma.hbm_to_vmem [thread:$0]  (!%p1357_p5), %s264_s9, 256, %s266_s15, [#allocation14], %s1571_s19, %s1571_s19, %s1570_s1  }
  0x32   : > { %s1267_s3 = smov [#allocation16]   ;;  %s293_s8 = scalar_lea.vmem [#allocation6], %s1403_s12 }
  0x33   : > { %917 = dma.vmem_to_smem (!%p1357_p5), %s279_s18, 16, %s1267_s3, [#allocation9]  }
  0x34   : > { %s301_s5 = sshll.u32 %s293_s8, 4  ;;  %s336_s1 = scalar_lea.hbm %s1533_s2, %s1406_s13  ;;  %s302_s5 = int_to_ptr.vmem [resolvable:$true] %s301_s5 }
  0x35   : > { %921 = dma.hbm_to_vmem [thread:$0]  (!%p1410_p6), %s300_s24, 64, %s302_s5, %s290_s16  }
  0x36   : > { %s331_s9 = scalar_lea.vmem [#allocation12], %s1403_s12  ;;  %s338_s15 = sshll.u32 %s336_s1, 4  ;;  %s339_s15 = int_to_ptr.hbm [resolvable:$true] %s338_s15 }
  0x37   : > { %s340_s14 = sshll.u32 %s331_s9, 4  ;;  %349 = sbr.rel (%p1349_p3) target bundleno = 784 (0x310), region = 48  ;;  %s341_s14 = int_to_ptr.vmem [resolvable:$true] %s340_s14 }
  0x38   : > { %927 = dma.hbm_to_vmem [thread:$0]  (!%p1410_p6), %s339_s15, 64, %s341_s14, %s309_s20  }
  0x39   : > { %s1452_s18 = sand.u32 (!%p1349_p3), 1, %s1245_s25  }
  0x3a   : > { %s1455_s5 = sshll.u32 (!%p1349_p3), %s1452_s18, 2  ;;  %s352_s6 = scalar_lea.sflag (!%p1349_p3), [#allocation7], %s1452_s18 }
  0x3b   : > { %s355_s24 = scalar_lea.vmem (!%p1349_p3), [#allocation6], %s1455_s5 }
  0x3c   : > { %1220 = dma.done.wait (%p1383_p12), %s352_s6, 64  }
  0x3d   : > { %1222 = vsyncadd (%p1383_p12), %s352_s6, 4294967232  ;;  %s361_s11 = sand.u32 1, %s1341_s30   ;;  %s365_s12 = scalar_lea.vmem [#allocation10], %s1455_s5 }
  0x3e   : > { %s362_s10 = scalar_lea.sflag [#allocation11], %s361_s11 }
  0x3f   : > { %1224 = dma.done.wait (%p1383_p12), %s362_s10, 128  }
  0x40   : > { %1226 = vsyncadd (%p1383_p12), %s362_s10, 4294967168  ;;  %s375_s13 = scalar_lea.vmem [#allocation12], %s1455_s5 }
  0x41   : > { %1228 = dma.done.wait (%p61_p1), [#allocation14], 384  }
  0x42   : > { %1230 = vsyncadd (%p61_p1), [#allocation14], 4294966912 }
  0x43   : > { %1232 = dma.done.wait (%p61_p1), [#allocation9], 16  }
  0x44   : > { %1234 = vsyncadd (%p61_p1), [#allocation9], 4294967280 }
  0x45   : > { %396 = sfence }
  0x46   : > { %v884_v0 = vld [vmem:[#allocation13] sm:$0xff]  ;;  %v439_v1 = vld [vmem:[%s355_s24] sm:$0xf]  ;;  %vm448_vm0 = vcmask 130048   ;;  %v468_v3 = vld [vmem:[%s365_s12] sm:$0xf]  ;;  %s680_s29 = scalar_lea.hbm %s1538_s7, %s1253_s27 }
  0x47   : > { %459 = vmatpush.bf16.msra.mxu0 %v884_v0  ;;  %v885_v2 = vld [vmem:[#allocation13] sm:$0xff]  ;;  %vm466_vm1 = vcmask 257024   ;;  %vm505_vm2 = vcmask 1043456   ;;  %v495_v9 = vld [vmem:[%s375_s13] sm:$0xf]  ;;  %vm501_vm3 = vcmask 64512  }
  0x48   : > { %487 = vmatpush.bf16.msra.mxu1 %v885_v2  ;;  %s1478_s30 = sld [smem:[#allocation16]]  ;;  %v995_v15 = vld [vmem:[%s1535_s4] ss:$0 sm:$0xff]  ;;  %v1268_v16 = vmov 8.0   ;;  %vm545_vm5 = vcmask 261120   ;;  %v886_v26 = vld [vmem:[#allocation15] sm:$0xff] }
  0x49   : > { %996 = vrcp.f32 %v1268_v16  ;;  %v887_v25 = vld [vmem:[#allocation15 + $0x8] sm:$0xff]  ;;  %s857_s20 = sld [smem:[#allocation16 + $0x1]]  ;;  %vm663_vm12 = vcmask 57344   ;;  %s431_s19 = scalar_lea.vmem [#allocation17], %s1452_s18  ;;  %vm669_vm13 = vcmask 122944  }
  0x4a   : > { %862 = vmatmul.msk.bf16.vlgmr.msra.gmra.mxu0 %vm448_vm0, %v439_v1  ;;  %s1269_s3 = smov 8   ;;  %s682_s8 = sshll.u32 %s431_s19, 4  ;;  %s683_s8 = int_to_ptr.vmem [resolvable:$true] %s682_s8 }
  0x4b   : > { %867 = vmatmul.msk.bf16.vlgmr.msra.gmra.mxu1 %vm448_vm0, %v468_v3  ;;  %617 = vmatpush.bf16.msrb.mxu0 %v887_v25  ;;  %s684_s16 = sshll.u32 %s680_s29, 4  ;;  %s672_s22 = scalar_lea.sflag [#allocation8], %s1452_s18  ;;  %s685_s16 = int_to_ptr.hbm [resolvable:$true] %s684_s16 }
  0x4c   : > { %s1181_s1 = sshra.s32 %s685_s16, 4  ;;  %s1187_s5 = scalar_lea.hbm %s1538_s7, 2  ;;  %s1182_s1 = int_to_ptr.hbm [resolvable:$true] %s1181_s1 }
  0x4d   : > { %s1183_s9 = scalar_lea.hbm %s1182_s1, 1  ;;  %p1188_p6 = scmp.lt.s32.totalorder %s1182_s1, %s1538_s7 }
  0x4e   : > { %v541_v18 = vstv %s1478_s30  ;;  %p1184_p1 = scmp.ne.s32.totalorder %s1182_s1, %s1183_s9  ;;  %p1189_p8 = scmp.lt.s32.totalorder %s1187_s5, %s1183_s9 }
  0x4f   : > { %v997_v21 = vpop.eup %996  ;;  %618 = vmatpush.bf16.msrb.mxu0 %v886_v26  ;;  %v626_v3 = vstv %s857_s20 }
  0x50   : > { %v565_v24 = vmul.f32 8.0, %v997_v21  ;;  %vm569_vm6 = vweird.f32 %v997_v21  ;;  %p1185_p3 = pnand %p1184_p1, %p1390_p4  ;;  %p1190_p10 = por %p1189_p8, %p1188_p6 }
  0x52   : > { %v566_v27 = vsub.f32 1.0, %v565_v24  ;;  %p1186_p5 = pneg %p1185_p3 }
  0x54   : > { %v567_v32 = vmul.f32 %v997_v21, %v566_v27  ;;  %p1191_p11 = pnand %p1190_p10, %p1186_p5 }
  0x56   : > { %v568_v36 = vadd.f32 %v997_v21, %v567_v32 }
  0x58   : > { %v570_v39 = vsel %vm569_vm6, %v997_v21, %v568_v36 }
  0xc7   : > { %v461_v4 = vpop.f32.mrf.mxu0 }
  0xc8   : > { %v465_v5 = vpack.c.bf16 %v461_v4, %v461_v4  ;;  %v489_v10 = vpop.f32.mrf.mxu1 }
  0xc9   : > { %v493_v11 = vpack.c.bf16 %v489_v10, %v489_v10 }
  0xca   : > { %467 = vst.msk [vmem:[#allocation2] sm:$0xf] %vm466_vm1, %v465_v5 }
  0xcb   : > { %494 = vst.msk [vmem:[#allocation3] sm:$0xf] %vm466_vm1, %v493_v11 }
  0xcf   : > { %v463_v6 = vpop.f32.mrf.mxu0 }
  0xd0   : > { %v491_v12 = vpop.f32.mrf.mxu1 }
  0xd1   : > { %v497_v7 = vld [vmem:[#allocation2] sm:$0xf] }
  0xd2   : > { %v507_v8 = vsel %vm505_vm2, %v497_v7, 0  ;;  %v522_v13 = vld [vmem:[#allocation3] sm:$0xf] }
  0xd3   : > { %516 = vmatpush.bf16.msra.mxu2 %v507_v8  ;;  %v524_v14 = vsel %vm505_vm2, %v522_v13, 0 }
  0xd4   : > { %533 = vmatpush.bf16.msra.mxu3 %v524_v14 }
  0xd6   : > { %868 = vmatmul.msk.bf16.vlgmr.msra.gmra.mxu2 %vm501_vm3, %v495_v9 }
  0xd7   : > { %869 = vmatmul.msk.bf16.vlgmr.msra.gmra.mxu3 %vm501_vm3, %v495_v9 }
 0x159   : > { %v518_v17 = vpop.f32.mrf.mxu2 }
 0x15a   : > { %v519_v19 = vadd.f32 %v995_v15, %v518_v17  ;;  %v535_v56 = vpop.f32.mrf.mxu3 }
 0x15b   : > { %v536_v57 = vadd.f32 %v995_v15, %v535_v56 }
 0x15c   : > { %vm540_vm4 = vcmp.gt.f32.partialorder %v519_v19, 0.0  ;;  %v542_v20 = vmul.f32 %v541_v18, %v519_v19 }
 0x15d   : > { %vm547_vm11 = vcmp.gt.f32.partialorder %v536_v57, 0.0  ;;  %v548_v58 = vmul.f32 %v541_v18, %v536_v57 }
 0x15e   : > { %v543_v22 = vsel %vm540_vm4, %v519_v19, %v542_v20 }
 0x15f   : > { %546 = vst.msk [vmem:[#allocation4] sm:$0xff] %vm545_vm5, %v543_v22  ;;  %v549_v59 = vsel %vm547_vm11, %v536_v57, %v548_v58 }
 0x160   : > { %551 = vst.msk [vmem:[#allocation5] sm:$0xff] %vm545_vm5, %v549_v59 }
 0x161   : > { %v520_v23 = vpop.f32.mrf.mxu2 }
 0x162   : > { %v537_v60 = vpop.f32.mrf.mxu3 }
 0x166   : > { %v555_v28 = vld [vmem:[#allocation4] sm:$0xff] }
 0x167   : > { %v557_v29 = vsel %vm545_vm5, %v555_v28, 0.0  ;;  %v625_v30 = vpack.c.bf16 %v555_v28, %v555_v28  ;;  %v556_v61 = vld [vmem:[#allocation5] sm:$0xff] }
 0x168   : > { %v558_v31 = vrot.slane %v557_v29, 4  ;;  %v646_v62 = vpack.c.bf16 %v556_v61, %v556_v61 }
 0x169   : > { %v631_v33 = vsel %vm545_vm5, %v625_v30, 0 }
 0x16a   : > { %v559_v34 = vadd.f32 %v558_v31, %v557_v29  ;;  %640 = vmatpush.bf16.xpose.msrb.mxu1 %v631_v33  ;;  %v648_v63 = vsel %vm545_vm5, %v646_v62, 0 }
 0x16b   : > { %657 = vmatpush.bf16.xpose.msrb.mxu2 %v648_v63 }
 0x16c   : > { %v560_v35 = vrot.slane %v559_v34, 2 }
 0x16e   : > { %v561_v37 = vadd.f32 %v560_v35, %v559_v34 }
 0x170   : > { %v562_v38 = vrot.slane %v561_v37, 1 }
 0x172   : > { %v563_v40 = vadd.f32 %v562_v38, %v561_v37 }
 0x174   : > { %v571_v41 = vmul.f32 %v570_v39, %v563_v40 }
 0x176   : > { %v870_v42 = vmul.f32 -1.442695, %v571_v41 }
 0x178   : > { %998 = vpow2.f32 %v870_v42 }
 0x17e   : > { %v999_v43 = vpop.eup %998 }
 0x17f   : > { %v575_v44 = vadd.f32 1.0, %v999_v43 }
 0x181   : > { %1000 = vrcp.f32 %v575_v44  ;;  %v587_v48 = vand.u32 2147483648, %v575_v44  ;;  %v585_v50 = vand.u32 2147483647, %v575_v44  ;;  %vm581_vm8 = vweird.f32 %v575_v44 }
 0x183   : > { %v588_v52 = vor.u32 1.1754944e-38, %v587_v48  ;;  %vm586_vm10 = vcmp.eq.f32.partialorder %v585_v50, 8.507059e+37 }
 0x187   : > { %v1001_v45 = vpop.eup %1000 }
 0x188   : > { %v577_v46 = vmul.f32 %v1001_v45, %v575_v44  ;;  %vm582_vm7 = vweird.f32 %v1001_v45 }
 0x189   : > { %vm583_vm9 = vmor %vm581_vm8, %vm582_vm7 }
 0x18a   : > { %v578_v47 = vsub.f32 1.0, %v577_v46 }
 0x18c   : > { %v579_v49 = vmul.f32 %v1001_v45, %v578_v47 }
 0x18e   : > { %v580_v51 = vadd.f32 %v1001_v45, %v579_v49 }
 0x190   : > { %v584_v53 = vsel %vm583_vm9, %v1001_v45, %v580_v51 }
 0x191   : > { %v589_v54 = vsel %vm586_vm10, %v588_v52, %v584_v53 }
 0x192   : > { %v591_v55 = vpack.c.bf16 %v589_v54, %v589_v54 }
 0x194   : > { %879 = vmatmul.msk.bf16.vlgmr.msrb.gmra.mxu0 %vm545_vm5, %v591_v55 }
 0x211   : > { %v620_v0 = vpop.f32.mrf.mxu0 }
 0x212   : > { %v624_v1 = vpack.c.bf16 %v620_v0, %v620_v0 }
 0x214   : > { %880 = vmatmul.msk.bf16.vlgmr.msrb.gmra.mxu1 %vm545_vm5, %v624_v1  ;;  %881 = vmatmul.msk.bf16.vlgmr.msrb.gmra.mxu2 %vm545_vm5, %v624_v1 }
 0x219   : > { %v622_v2 = vpop.f32.mrf.mxu0 }
 0x291   : > { %v642_v4 = vpop.f32.mrf.mxu1 }
 0x292   : > { %v643_v5 = vadd.f32 %v642_v4, %v626_v3 }
 0x294   : > { %664 = vst.msk [vmem:[%s431_s19] sm:$0x1] %vm663_vm12, %v643_v5 }
 0x297   : > { %v659_v6 = vpop.f32.mrf.mxu2 }
 0x298   : > { %v660_v7 = vadd.f32 %v659_v6, %v626_v3 }
 0x299   : > { %v644_v8 = vpop.f32.mrf.mxu1 }
 0x29a   : > { %666 = vrot.lane.b32.xlu0 %v660_v7, %s1269_s3 }
 0x29f   : > { %v661_v9 = vpop.f32.mrf.mxu2 }
 0x30c   : > { %v667_v10 = vpop.permute.xlu0 %666 }
 0x30d   : > { %670 = vst.msk [vmem:[%s431_s19] sm:$0x1] %vm669_vm13, %v667_v10 }
 0x30e   : > { %1194 = shalt.err (!%p1191_p11)
}
 0x30f   : > { %906 = dma.vmem_to_hbm [thread:$0]  (%p1390_p4), %s683_s8, 16, %s685_s16, %s672_s22  }
 0x310 PF: > { %s1572_s18 = sld [smem:[#allocation23_spill]] }
 0x311   : > { %s1574_s11 = sld [smem:[#allocation26_spill]] }
 0x316   : > { %s696_s10 = sand.u32 1, %s1572_s18  }
 0x317   : > { %p1575_p12 = scmp.ge.s32.totalorder %s1574_s11, 2  ;;  %s697_s12 = scalar_lea.sflag [#allocation8], %s696_s10 }
 0x319   : > { %p929_p13 = pnand %p1575_p12, %p1398_p9 }
 0x31b   : > { %p930_p0 = pneg %p929_p13 }
 0x31d   : > { %1236 = dma.done.wait (%p930_p0), %s697_s12, 16  }
 0x31e   : > { %1238 = vsyncadd (%p930_p0), %s697_s12, 4294967280  ;;  %s28_s29 = sadd.s32 1, %s1574_s11   ;;  %s1576_s13 = sld [smem:[#allocation24_spill]] }
 0x31f   : > { %p25_p2 = scmp.ge.s32.totalorder %s28_s29, 4   ;;  %s1577_s26 = sld [smem:[#allocation28_spill]] }
 0x320   : > { %s1578_s27 = sld [smem:[#allocation25_spill]]  ;;  %s1580_s24 = smov %s1245_s25 }
 0x321   : > { %s1579_s28 = sld [smem:[#allocation27_spill]]  ;;  %27 = sbr.rel (!%p25_p2) target bundleno = 15 (0xf), region = 140 }
 0x324   : > { %s1581_s25 = smov %s1576_s13 }
 0x326   :  { %702 = vsyncpa [#allocation7], 1 }
 0x327   :  { %704 = vsyncpa [#allocation7 + $0x1], 1 }
 0x328   :  { %705 = vsyncpa [#allocation11], 1 }
 0x329   :  { %707 = vsyncpa [#allocation11 + $0x1], 1 }
 0x32a   :  { %708 = vsyncpa [#allocation14], 1 }
 0x32b   :  { %709 = vsyncpa [#allocation8], 1 }
 0x32c   :  { %711 = vsyncpa [#allocation8 + $0x1], 1 }
 0x32d   :  { %712 = vsyncpa [#allocation9], 1 }
 0x32e   :  { %714 = vsyncpa [#allocation9 + $0x1], 1 }

</bundles_post_ra>
